<compile_context>
chip_gen: v5e
topology: v5e:2x2
jax: 0.10.0
libtpu: 0.0.40
codegen_flags: <defaults>
</compile_context>

<pallas_src>
import functools

import jax
import jax.numpy as jnp
from jax.experimental import pallas as pl
from jax.experimental.pallas import tpu as pltpu


def _mlp_edge_kernel(src_ref, dst_ref,
                     w1a_ref, w1b_ref, b1_ref,
                     w2_ref, b2_ref, w3_ref, b3_ref,
                     out_ref):
    """One feature-major tile of edges: full 3-layer MLP fused in VMEM.

    src_ref/dst_ref: (h_feats, tile_e)   [compute dtype]
    w1a/w1b:         (h, h_feats)        [compute dtype]
    w2:              (h/2, h)            [compute dtype]
    b1:(h,1) b2:(h/2,1) w3:(h/2,1) b3:(1,1)  [f32]
    out_ref:         (1, tile_e)         [f32, lane-dense scores]
    """
    src = src_ref[...]
    dst = dst_ref[...]

    # Layer 1: concat removed by splitting W1 into src/dst halves.
    z1 = (jnp.dot(w1a_ref[...], src, preferred_element_type=jnp.float32)
          + jnp.dot(w1b_ref[...], dst, preferred_element_type=jnp.float32))
    z1 = jnp.maximum(z1 + b1_ref[...], 0.0)                  # (h, te), f32
    z1 = z1.astype(w2_ref.dtype)

    # Layer 2.
    z2 = jnp.dot(w2_ref[...], z1, preferred_element_type=jnp.float32)
    z2 = jnp.maximum(z2 + b2_ref[...], 0.0)                  # (h/2, te), f32

    # Layer 3: output width 1 -> VPU multiply + sublane reduce (XLU), writing a
    # lane-dense (1, tile_e) row instead of an N=1 MXU matmul / 1-lane store.
    score = jnp.sum(z2 * w3_ref[...], axis=0, keepdims=True) + b3_ref[...]
    out_ref[...] = score


@functools.partial(jax.jit, static_argnames=("tile_e", "compute_dtype"))
def mlp_predictor_scores(h_src, h_dst, params, *, tile_e=2048,
                         compute_dtype=jnp.float32):
    """Per-edge scores. h_src, h_dst: [E, h_feats] float32 -> [E] float32."""
    E, h_feats = h_src.shape
    w1a, w1b, b1, w2, b2, w3, b3 = params
    cd = jnp.dtype(compute_dtype)

    # Lane-align the edge tile and clamp it to the (padded) edge count; pad the
    # last tile instead of asserting E % tile_e == 0.
    tile_e = max(128, (int(tile_e) // 128) * 128)
    e_pad = ((E + 127) // 128) * 128
    tile_e = min(tile_e, e_pad)
    e_pad = pl.cdiv(E, tile_e) * tile_e
    grid = (e_pad // tile_e,)

    # Feature-major (lane = edges) inputs; optional bf16 to halve HBM reads.
    src_t = h_src.T.astype(cd)                       # (h_feats, E)
    dst_t = h_dst.T.astype(cd)
    if e_pad != E:
        pad = e_pad - E
        src_t = jnp.pad(src_t, ((0, 0), (0, pad)))
        dst_t = jnp.pad(dst_t, ((0, 0), (0, pad)))

    w1a_c = w1a.astype(cd)
    w1b_c = w1b.astype(cd)
    w2_c = w2.astype(cd)

    edge_map = lambda i: (0, i)
    full_map = lambda i: (0, 0)

    out = pl.pallas_call(
        _mlp_edge_kernel,
        out_shape=jax.ShapeDtypeStruct((1, e_pad), jnp.float32),
        grid_spec=pltpu.PrefetchScalarGridSpec(
            num_scalar_prefetch=0,
            grid=grid,
            in_specs=[
                pl.BlockSpec((h_feats, tile_e), edge_map),    # src tile
                pl.BlockSpec((h_feats, tile_e), edge_map),    # dst tile
                pl.BlockSpec(w1a.shape, full_map),            # W1[:, :h]   (h, h)
                pl.BlockSpec(w1b.shape, full_map),            # W1[:, h:]   (h, h)
                pl.BlockSpec(b1.shape, full_map),             # b1          (h, 1)
                pl.BlockSpec(w2.shape, full_map),             # W2          (h/2, h)
                pl.BlockSpec(b2.shape, full_map),             # b2          (h/2, 1)
                pl.BlockSpec(w3.shape, full_map),             # W3^T column (h/2, 1)
                pl.BlockSpec(b3.shape, full_map),             # b3          (1, 1)
            ],
            out_specs=pl.BlockSpec((1, tile_e), edge_map),    # lane-dense scores
        ),
        compiler_params=pltpu.CompilerParams(
            dimension_semantics=("parallel",)),               # shards on v7x megacore
    )(src_t, dst_t, w1a_c, w1b_c, b1, w2_c, b2, w3, b3)

    return out[0, :E]  # drop padding + squeeze(1)


def init_params(key, h_feats):
    """Deterministic init matching nn.Linear shapes (torch (out,in) layout)."""
    k = jax.random.split(key, 6)

    def linear(kw, kb, fan_in, fan_out):
        bound = 1.0 / jnp.sqrt(fan_in)
        w = jax.random.uniform(kw, (fan_out, fan_in), jnp.float32, -bound, bound)
        b = jax.random.uniform(kb, (fan_out, 1), jnp.float32, -bound, bound)
        return w, b

    w1, b1 = linear(k[0], k[1], h_feats * 2, h_feats)     # (h, 2h), (h,1)
    w2, b2 = linear(k[2], k[3], h_feats, h_feats // 2)    # (h/2, h), (h/2,1)
    w3, b3 = linear(k[4], k[5], h_feats // 2, 1)          # (1, h/2), (1,1)
    w1a = w1[:, :h_feats]                                 # src half of W1
    w1b = w1[:, h_feats:]                                 # dst half of W1
    return (w1a, w1b, b1, w2, b2, w3.T, b3)               # w3 stored as (h/2, 1)


def reference_scores(h_src, h_dst, params):
    """Pure-JAX reference of the PyTorch forward."""
    w1a, w1b, b1, w2, b2, w3, b3 = params
    h = jnp.concatenate([h_src, h_dst], axis=1)
    w1 = jnp.concatenate([w1a, w1b], axis=1)              # (h, 2h)
    z1 = jax.nn.relu(h @ w1.T + b1[:, 0])
    z2 = jax.nn.relu(z1 @ w2.T + b2[:, 0])
    return (z2 @ w3 + b3[:, 0])[:, 0]


if __name__ == "__main__":
    key = jax.random.PRNGKey(0)
    k_params, k_nodes, k_src, k_dst = jax.random.split(key, 4)

    h_feats = 32       # hidden feature size
    num_nodes = 64     # synthetic graph nodes
    num_edges = 300    # deliberately NOT a multiple of 128 (exercises padding)

    params = init_params(k_params, h_feats)

    # Node embeddings (as produced by the upstream GCN).
    node_h = jax.random.normal(k_nodes, (num_nodes, h_feats), jnp.float32)

    # Synthetic ('user','attempts','question') edge list; per-edge feature
    # gather done in plain JAX (DGL's edges.src['h'] / edges.dst['h']).
    src_idx = jax.random.randint(k_src, (num_edges,), 0, num_nodes)
    dst_idx = jax.random.randint(k_dst, (num_edges,), 0, num_nodes)
    # TODO(synk): fuse this per-edge row gather into the kernel (scalar-prefetch
    # indices + manual row DMAs); BlockSpec cannot express dynamic per-edge rows
    # at large tile_e, so the gather is left to XLA here.
    h_src = node_h[src_idx]
    h_dst = node_h[dst_idx]

    ref = reference_scores(h_src, h_dst, params)

    # f32 path (bit-accurate vs. the reference).
    scores = jax.block_until_ready(mlp_predictor_scores(h_src, h_dst, params))
    assert scores.shape == (num_edges,)
    assert jnp.allclose(scores, ref, atol=1e-5, rtol=1e-5)

    # bf16 compute path (halves HBM read traffic on v6e/v7x); looser tolerance.
    scores_bf16 = jax.block_until_ready(
        mlp_predictor_scores(h_src, h_dst, params, compute_dtype=jnp.bfloat16))
    assert scores_bf16.shape == (num_edges,)
    assert jnp.allclose(scores_bf16, ref, atol=5e-2, rtol=5e-2)

    print("KERNEL_OK")
</pallas_src>

<mosaic_0001>
module attributes {stable_mosaic.version = 11 : i64} {
  func.func @_mlp_edge_kernel(%arg0: i32, %arg1: memref<32x384xf32, #tpu.memory_space<vmem>>, %arg2: memref<32x384xf32, #tpu.memory_space<vmem>>, %arg3: memref<32x32xf32, #tpu.memory_space<vmem>>, %arg4: memref<32x32xf32, #tpu.memory_space<vmem>>, %arg5: memref<32x1xf32, #tpu.memory_space<vmem>>, %arg6: memref<16x32xf32, #tpu.memory_space<vmem>>, %arg7: memref<16x1xf32, #tpu.memory_space<vmem>>, %arg8: memref<16x1xf32, #tpu.memory_space<vmem>>, %arg9: memref<1x1xf32, #tpu.memory_space<vmem>>, %arg10: memref<1x384xf32, #tpu.memory_space<vmem>>) attributes {dimension_semantics = [#tpu.dimension_semantics<parallel>], iteration_bounds = array<i64: 1>, scalar_prefetch = 0 : i64, scratch_operands = 0 : i64, tpu.core_type = #tpu.core_type<tc>, window_params = [{transform_indices = @transform_0, window_bounds = array<i64: 32, 384>}, {transform_indices = @transform_1, window_bounds = array<i64: 32, 384>}, {pipeline_mode = #tpu.pipeline_mode<synchronous>, transform_indices = @transform_2, window_bounds = array<i64: 32, 32>}, {pipeline_mode = #tpu.pipeline_mode<synchronous>, transform_indices = @transform_3, window_bounds = array<i64: 32, 32>}, {pipeline_mode = #tpu.pipeline_mode<synchronous>, transform_indices = @transform_4, window_bounds = array<i64: 32, 1>}, {pipeline_mode = #tpu.pipeline_mode<synchronous>, transform_indices = @transform_5, window_bounds = array<i64: 16, 32>}, {pipeline_mode = #tpu.pipeline_mode<synchronous>, transform_indices = @transform_6, window_bounds = array<i64: 16, 1>}, {pipeline_mode = #tpu.pipeline_mode<synchronous>, transform_indices = @transform_7, window_bounds = array<i64: 16, 1>}, {pipeline_mode = #tpu.pipeline_mode<synchronous>, transform_indices = @transform_8, window_bounds = array<i64: 1, 1>}, {transform_indices = @transform_9, window_bounds = array<i64: 1, 384>}]} {
    %c0 = arith.constant 0 : index
    %c0_0 = arith.constant 0 : index
    %0 = vector.load %arg1[%c0, %c0_0] : memref<32x384xf32, #tpu.memory_space<vmem>>, vector<32x384xf32>
    %c0_1 = arith.constant 0 : index
    %c0_2 = arith.constant 0 : index
    %1 = vector.load %arg2[%c0_1, %c0_2] : memref<32x384xf32, #tpu.memory_space<vmem>>, vector<32x384xf32>
    %c0_3 = arith.constant 0 : index
    %c0_4 = arith.constant 0 : index
    %2 = vector.load %arg3[%c0_3, %c0_4] : memref<32x32xf32, #tpu.memory_space<vmem>>, vector<32x32xf32>
    %cst = arith.constant dense<0.000000e+00> : vector<32x384xf32>
    %3 = tpu.matmul %2, %0, %cst {dimension_numbers = #tpu.dot_dimension_numbers<[1], [0], [0], [1], [0, 0, 1, 1], [], []>} : vector<32x32xf32>, vector<32x384xf32>, vector<32x384xf32> -> vector<32x384xf32>
    %c0_5 = arith.constant 0 : index
    %c0_6 = arith.constant 0 : index
    %4 = vector.load %arg4[%c0_5, %c0_6] : memref<32x32xf32, #tpu.memory_space<vmem>>, vector<32x32xf32>
    %cst_7 = arith.constant dense<0.000000e+00> : vector<32x384xf32>
    %5 = tpu.matmul %4, %1, %cst_7 {dimension_numbers = #tpu.dot_dimension_numbers<[1], [0], [0], [1], [0, 0, 1, 1], [], []>} : vector<32x32xf32>, vector<32x384xf32>, vector<32x384xf32> -> vector<32x384xf32>
    %6 = arith.addf %3, %5 : vector<32x384xf32>
    %c0_8 = arith.constant 0 : index
    %c0_9 = arith.constant 0 : index
    %7 = vector.load %arg5[%c0_8, %c0_9] : memref<32x1xf32, #tpu.memory_space<vmem>>, vector<32x1xf32>
    %8 = vector.broadcast %7 : vector<32x1xf32> to vector<32x384xf32>
    %9 = arith.addf %6, %8 : vector<32x384xf32>
    %cst_10 = arith.constant 0.000000e+00 : f32
    %10 = vector.broadcast %cst_10 : f32 to vector<32x384xf32>
    %11 = arith.maximumf %9, %10 : vector<32x384xf32>
    %c0_11 = arith.constant 0 : index
    %c0_12 = arith.constant 0 : index
    %12 = vector.load %arg6[%c0_11, %c0_12] : memref<16x32xf32, #tpu.memory_space<vmem>>, vector<16x32xf32>
    %cst_13 = arith.constant dense<0.000000e+00> : vector<16x384xf32>
    %13 = tpu.matmul %12, %11, %cst_13 {dimension_numbers = #tpu.dot_dimension_numbers<[1], [0], [0], [1], [0, 0, 1, 1], [], []>} : vector<16x32xf32>, vector<32x384xf32>, vector<16x384xf32> -> vector<16x384xf32>
    %c0_14 = arith.constant 0 : index
    %c0_15 = arith.constant 0 : index
    %14 = vector.load %arg7[%c0_14, %c0_15] : memref<16x1xf32, #tpu.memory_space<vmem>>, vector<16x1xf32>
    %15 = vector.broadcast %14 : vector<16x1xf32> to vector<16x384xf32>
    %16 = arith.addf %13, %15 : vector<16x384xf32>
    %cst_16 = arith.constant 0.000000e+00 : f32
    %17 = vector.broadcast %cst_16 : f32 to vector<16x384xf32>
    %18 = arith.maximumf %16, %17 : vector<16x384xf32>
    %c0_17 = arith.constant 0 : index
    %c0_18 = arith.constant 0 : index
    %19 = vector.load %arg8[%c0_17, %c0_18] : memref<16x1xf32, #tpu.memory_space<vmem>>, vector<16x1xf32>
    %20 = vector.broadcast %19 : vector<16x1xf32> to vector<16x384xf32>
    %21 = arith.mulf %18, %20 : vector<16x384xf32>
    %cst_19 = arith.constant dense<0.000000e+00> : vector<384xf32>
    %22 = vector.multi_reduction <add>, %21, %cst_19 [0] : vector<16x384xf32> to vector<384xf32>
    %23 = vector.shape_cast %22 : vector<384xf32> to vector<1x384xf32>
    %c0_20 = arith.constant 0 : index
    %c0_21 = arith.constant 0 : index
    %24 = vector.load %arg9[%c0_20, %c0_21] : memref<1x1xf32, #tpu.memory_space<vmem>>, vector<1x1xf32>
    %25 = vector.broadcast %24 : vector<1x1xf32> to vector<1x384xf32>
    %26 = arith.addf %23, %25 : vector<1x384xf32>
    %c0_22 = arith.constant 0 : index
    %c0_23 = arith.constant 0 : index
    %27 = vector.load %arg10[%c0_22, %c0_23] : memref<1x384xf32, #tpu.memory_space<vmem>>, vector<1x384xf32>
    tpu.vector_store %arg10[%c0_22, %c0_23], %26 {strides = array<i32>} : memref<1x384xf32, #tpu.memory_space<vmem>>, vector<1x384xf32>,
    return
  }
  func.func @transform_0(%arg0: i32) -> (i32, i32) {
    %c0_i32 = arith.constant 0 : i32
    %c0_i32_0 = arith.constant 0 : i32
    return %c0_i32, %arg0 : i32, i32
  }
  func.func @transform_1(%arg0: i32) -> (i32, i32) {
    %c0_i32 = arith.constant 0 : i32
    %c0_i32_0 = arith.constant 0 : i32
    return %c0_i32, %arg0 : i32, i32
  }
  func.func @transform_2(%arg0: i32) -> (i32, i32) {
    %c0_i32 = arith.constant 0 : i32
    %c0_i32_0 = arith.constant 0 : i32
    %c0_i32_1 = arith.constant 0 : i32
    return %c0_i32, %c0_i32_0 : i32, i32
  }
  func.func @transform_3(%arg0: i32) -> (i32, i32) {
    %c0_i32 = arith.constant 0 : i32
    %c0_i32_0 = arith.constant 0 : i32
    %c0_i32_1 = arith.constant 0 : i32
    return %c0_i32, %c0_i32_0 : i32, i32
  }
  func.func @transform_4(%arg0: i32) -> (i32, i32) {
    %c0_i32 = arith.constant 0 : i32
    %c0_i32_0 = arith.constant 0 : i32
    %c0_i32_1 = arith.constant 0 : i32
    return %c0_i32, %c0_i32_0 : i32, i32
  }
  func.func @transform_5(%arg0: i32) -> (i32, i32) {
    %c0_i32 = arith.constant 0 : i32
    %c0_i32_0 = arith.constant 0 : i32
    %c0_i32_1 = arith.constant 0 : i32
    return %c0_i32, %c0_i32_0 : i32, i32
  }
  func.func @transform_6(%arg0: i32) -> (i32, i32) {
    %c0_i32 = arith.constant 0 : i32
    %c0_i32_0 = arith.constant 0 : i32
    %c0_i32_1 = arith.constant 0 : i32
    return %c0_i32, %c0_i32_0 : i32, i32
  }
  func.func @transform_7(%arg0: i32) -> (i32, i32) {
    %c0_i32 = arith.constant 0 : i32
    %c0_i32_0 = arith.constant 0 : i32
    %c0_i32_1 = arith.constant 0 : i32
    return %c0_i32, %c0_i32_0 : i32, i32
  }
  func.func @transform_8(%arg0: i32) -> (i32, i32) {
    %c0_i32 = arith.constant 0 : i32
    %c0_i32_0 = arith.constant 0 : i32
    %c0_i32_1 = arith.constant 0 : i32
    return %c0_i32, %c0_i32_0 : i32, i32
  }
  func.func @transform_9(%arg0: i32) -> (i32, i32) {
    %c0_i32 = arith.constant 0 : i32
    %c0_i32_0 = arith.constant 0 : i32
    return %c0_i32, %arg0 : i32, i32
  }
}

</mosaic_0001>

<bundles_post_ra>
// kernel: mlp_predictor_scores.1
= control target key start
LH: loop header
LB: loop body
LE: loop exit
PB: predicated region body
PF: predicated region fallthrough
CT: control target
= control target key end

     0   :  { %v510_v3 = vmov 0   ;;  %vm66_vm0 = vcmask 261120   ;;  %vm462_vm1 = vcmask 1040384   ;;  %vm464_vm2 = vcmask 1041408   ;;  %s723_s1 = inlined_call_operand.vmem [shape: f32[32,384], index: 1, kind: input, shape index: {}]   ;;  %s724_s0 = inlined_call_operand.vmem [shape: f32[32,384], index: 0, kind: input, shape index: {}]   ;;  %s725_s3 = inlined_call_operand.vmem [shape: f32[32,32], index: 3, kind: input, shape index: {}]   ;;  %s726_s4 = inlined_call_operand.vmem [shape: f32[32,1], index: 4, kind: input, shape index: {}]   ;;  %s727_s2 = inlined_call_operand.vmem [shape: f32[32,32], index: 2, kind: input, shape index: {}]   ;;  %s728_s7 = inlined_call_operand.vmem [shape: f32[16,1], index: 7, kind: input, shape index: {}]   ;;  %s729_s5 = inlined_call_operand.vmem [shape: f32[16,32], index: 5, kind: input, shape index: {}]   ;;  %s730_s6 = inlined_call_operand.vmem [shape: f32[16,1], index: 6, kind: input, shape index: {}]   ;;  %s731_s8 = inlined_call_operand.<no memory space> [shape: f32[1,1], index: 8, kind: input, shape index: {}]   ;;  %s732_s9 = inlined_call_operand.vmem [shape: f32[1,384], index: 9, kind: output, shape index: {}]  }
   0x1   :  { %v55_v0 = vld [vmem:[%s723_s1 + $0x48] sm:$0xff]  ;;  %v56_v1 = vld [vmem:[%s723_s1 + $0x50] sm:$0xff]  ;;  %508 = vset.pattern.permute.xlu1 %v510_v3  ;;  %507 = vset.pattern.permute.xlu0 %v510_v3  ;;  %v53_v5 = vld [vmem:[%s723_s1 + $0x38] sm:$0xff] }
   0x2   :  { %v43_v2 = vld [vmem:[%s724_s0 + $0x48] sm:$0xff]  ;;  %91 = vmatpush.msra.mxu0 %v55_v0  ;;  %120 = vmatpush.msra.mxu1 %v56_v1  ;;  %v52_v4 = vld [vmem:[%s723_s1 + $0x30] sm:$0xff]  ;;  %v49_v7 = vld [vmem:[%s723_s1 + $0x18] sm:$0xff] }
   0x3   :  { %v40_v6 = vld [vmem:[%s724_s0 + $0x30] sm:$0xff]  ;;  %190 = vmatpush.msra.mxu3 %v43_v2  ;;  %v50_v8 = vld [vmem:[%s723_s1 + $0x20] sm:$0xff]  ;;  %509 = vset.pattern.permute.xlu2 %v510_v3  ;;  %v37_v9 = vld [vmem:[%s724_s0 + $0x18] sm:$0xff] }
   0x4   :  { %92 = vmatpush.msra.mxu0 %v52_v4  ;;  %121 = vmatpush.msra.mxu1 %v53_v5  ;;  %v46_v10 = vld [vmem:[%s723_s1] sm:$0xff]  ;;  %v47_v11 = vld [vmem:[%s723_s1 + $0x8] sm:$0xff]  ;;  %v57_v16 = vld [vmem:[%s723_s1 + $0x58] sm:$0xff] }
   0x5   :  { %191 = vmatpush.msra.mxu3 %v40_v6  ;;  %v34_v12 = vld [vmem:[%s724_s0] sm:$0xff]  ;;  %v266_v14 = vld [vmem:[%s726_s4 + $0x8] sm:$0xff]  ;;  %v44_v18 = vld [vmem:[%s724_s0 + $0x50] sm:$0xff]  ;;  %149 = vmatpush.msra.mxu2 %v57_v16 }
   0x6   :  { %93 = vmatpush.msra.mxu0 %v49_v7  ;;  %122 = vmatpush.msra.mxu1 %v50_v8  ;;  %v62_v13 = vld [vmem:[%s725_s3] sm:$0xff]  ;;  %v45_v19 = vld [vmem:[%s724_s0 + $0x58] sm:$0xff]  ;;  %v51_v24 = vld [vmem:[%s723_s1 + $0x28] sm:$0xff] }
   0x7   :  { %192 = vmatpush.msra.mxu3 %v37_v9  ;;  %v58_v15 = vld [vmem:[%s727_s2] sm:$0xff]  ;;  %276 = vperm.xlu1 %508, %v266_v14   ;;  %v268_v20 = vld [vmem:[%s726_s4 + $0x18] sm:$0xff]  ;;  %v39_v26 = vld [vmem:[%s724_s0 + $0x28] sm:$0xff] }
   0x8   :  { %94 = vmatpush.msra.mxu0 %v46_v10  ;;  %123 = vmatpush.msra.mxu1 %v47_v11  ;;  %v54_v17 = vld [vmem:[%s723_s1 + $0x40] sm:$0xff]  ;;  %v41_v21 = vld [vmem:[%s724_s0 + $0x38] sm:$0xff]  ;;  %v63_v27 = vld [vmem:[%s725_s3 + $0x8] sm:$0xff] }
   0x9   :  { %193 = vmatpush.msra.mxu3 %v34_v12  ;;  %476 = vmatmul.msk.f32.vlgmr.msra.gmra.mxu0 %vm66_vm0, %v62_v13  ;;  %v42_v22 = vld [vmem:[%s724_s0 + $0x40] sm:$0xff]  ;;  %v48_v28 = vld [vmem:[%s723_s1 + $0x10] sm:$0xff]  ;;  %v59_v29 = vld [vmem:[%s727_s2 + $0x8] sm:$0xff]  ;;  %v14_v12 = vstv %s731_s8 }
   0xa   :  { %480 = vmatmul.msk.f32.vlgmr.msra.gmra.mxu1 %vm66_vm0, %v62_v13  ;;  %488 = vmatmul.msk.f32.vlgmr.msra.gmra.mxu3 %vm66_vm0, %v58_v15  ;;  %v265_v23 = vld [vmem:[%s726_s4] sm:$0xff]  ;;  %v35_v30 = vld [vmem:[%s724_s0 + $0x8] sm:$0xff]  ;;  %v36_v31 = vld [vmem:[%s724_s0 + $0x10] sm:$0xff]  ;;  %15 = vst [vmem:[#allocation2] sm:$0x1] %v14_v12 }
   0xb   :  { %219 = vmatpush.msrb.mxu0 %v44_v18  ;;  %248 = vmatpush.msrb.mxu1 %v45_v19  ;;  %v38_v25 = vld [vmem:[%s724_s0 + $0x20] sm:$0xff]  ;;  %v267_v32 = vld [vmem:[%s726_s4 + $0x10] sm:$0xff]  ;;  %v409_v36 = vld [vmem:[%s728_s7 + $0x8] sm:$0xff] }
   0xc   :  { %286 = vperm.xlu0 %507, %v268_v20   ;;  %150 = vmatpush.msra.mxu2 %v54_v17  ;;  %v64_v33 = vld [vmem:[%s725_s3 + $0x10] sm:$0xff]  ;;  %v408_v35 = vld [vmem:[%s728_s7] sm:$0xff]  ;;  %v65_v37 = vld [vmem:[%s725_s3 + $0x18] sm:$0xff] }
   0xd   :  { %220 = vmatpush.msrb.mxu0 %v41_v21  ;;  %249 = vmatpush.msrb.mxu1 %v42_v22  ;;  %v60_v34 = vld [vmem:[%s727_s2 + $0x10] sm:$0xff]  ;;  %v61_v38 = vld [vmem:[%s727_s2 + $0x18] sm:$0xff]  ;;  %v313_v9 = vld [vmem:[%s729_s5] sm:$0xff] }
   0xe   :  { %151 = vmatpush.msra.mxu2 %v51_v24  ;;  %v315_v11 = vld [vmem:[%s730_s6] sm:$0xff]  ;;  %v316_v16 = vld [vmem:[%s730_s6 + $0x8] sm:$0xff] }
   0xf   :  { %271 = vperm.xlu1 %508, %v265_v23   ;;  %221 = vmatpush.msrb.mxu0 %v38_v25 }
  0x10   :  { %250 = vmatpush.msrb.mxu1 %v39_v26  ;;  %152 = vmatpush.msra.mxu2 %v48_v28 }
  0x11   :  { %477 = vmatmul.msk.f32.gmra.mxu0 %vm66_vm0, %v63_v27  ;;  %484 = vmatmul.msk.f32.vlgmr.msra.gmra.mxu2 %vm66_vm0, %v62_v13 }
  0x12   :  { %481 = vmatmul.msk.f32.gmra.mxu1 %vm66_vm0, %v63_v27  ;;  %489 = vmatmul.msk.f32.gmra.mxu3 %vm66_vm0, %v59_v29 }
  0x13   :  { %222 = vmatpush.msrb.mxu0 %v35_v30  ;;  %251 = vmatpush.msrb.mxu1 %v36_v31 }
  0x14   :  { %281 = vperm.xlu0 %507, %v267_v32   ;;  %319 = vperm.xlu2 %509, %v315_v11  }
  0x17   :  { %417 = vperm.xlu1 %508, %v409_v36  }
  0x19   :  { %478 = vmatmul.msk.f32.gmra.mxu0 %vm66_vm0, %v64_v33  ;;  %485 = vmatmul.msk.f32.gmra.mxu2 %vm66_vm0, %v63_v27 }
  0x1a   :  { %482 = vmatmul.msk.f32.gmra.mxu1 %vm66_vm0, %v64_v33  ;;  %490 = vmatmul.msk.f32.gmra.mxu3 %vm66_vm0, %v60_v34 }
  0x1c   :  { %412 = vperm.xlu0 %507, %v408_v35   ;;  %324 = vperm.xlu2 %509, %v316_v16  }
  0x21   :  { %479 = vmatmul.msk.f32.gmra.mxu0 %vm66_vm0, %v65_v37  ;;  %486 = vmatmul.msk.f32.gmra.mxu2 %vm66_vm0, %v64_v33 }
  0x22   :  { %483 = vmatmul.msk.f32.gmra.mxu1 %vm66_vm0, %v65_v37  ;;  %491 = vmatmul.msk.f32.gmra.mxu3 %vm66_vm0, %v61_v38 }
  0x29   :  { %492 = vmatmul.msk.f32.vlgmr.msrb.gmra.mxu0 %vm66_vm0, %v58_v15  ;;  %487 = vmatmul.msk.f32.gmra.mxu2 %vm66_vm0, %v65_v37 }
  0x2a   :  { %496 = vmatmul.msk.f32.vlgmr.msrb.gmra.mxu1 %vm66_vm0, %v58_v15  ;;  %v314_v15 = vld [vmem:[%s729_s5 + $0x8] sm:$0xff] }
  0x31   :  { %493 = vmatmul.msk.f32.gmra.mxu0 %vm66_vm0, %v59_v29 }
  0x32   :  { %497 = vmatmul.msk.f32.gmra.mxu1 %vm66_vm0, %v59_v29 }
  0x39   :  { %494 = vmatmul.msk.f32.gmra.mxu0 %vm66_vm0, %v60_v34 }
  0x3a   :  { %498 = vmatmul.msk.f32.gmra.mxu1 %vm66_vm0, %v60_v34  ;;  %v447_v34 = vld [vmem:[#allocation2] sm:$0x1] }
  0x3b   :  { %450 = vperm.xlu2 %509, %v447_v34  }
  0x41   :  { %495 = vmatmul.msk.f32.gmra.mxu0 %vm66_vm0, %v61_v38 }
  0x42   :  { %499 = vmatmul.msk.f32.gmra.mxu1 %vm66_vm0, %v61_v38 }
  0x79   :  { %v277_v49 = vpop.permute.xlu1 %276 }
  0x7e   :  { %v287_v47 = vpop.permute.xlu0 %286 }
  0x81   :  { %v272_v63 = vpop.permute.xlu1 %271 }
  0x86   :  { %v96_v39 = vpop.f32.mrf.mxu0  ;;  %v282_v54 = vpop.permute.xlu0 %281 }
  0x87   :  { %v125_v40 = vpop.f32.mrf.mxu1 }
  0x8d   :  { %v195_v41 = vpop.f32.mrf.mxu3 }
  0x8e   :  { %v99_v42 = vpop.f32.mrf.mxu0  ;;  %v196_v60 = vadd.f32 %v195_v41, %v96_v39 }
  0x8f   :  { %v128_v43 = vpop.f32.mrf.mxu1 }
  0x90   :  { %v289_v4 = vadd.f32 %v272_v63, %v196_v60 }
  0x92   :  { %v301_v8 = vmax.f32 %v289_v4, 0.0 }
  0x94   :  { %v154_v52 = vpop.f32.mrf.mxu2 }
  0x95   :  { %v198_v44 = vpop.f32.mrf.mxu3 }
  0x96   :  { %v102_v45 = vpop.f32.mrf.mxu0  ;;  %v199_v56 = vadd.f32 %v198_v44, %v99_v42 }
  0x97   :  { %v131_v46 = vpop.f32.mrf.mxu1 }
  0x98   :  { %v292_v2 = vadd.f32 %v277_v49, %v199_v56 }
  0x9a   :  { %v304_v6 = vmax.f32 %v292_v2, 0.0 }
  0x9c   :  { %v157_v0 = vpop.f32.mrf.mxu2 }
  0x9d   :  { %v201_v48 = vpop.f32.mrf.mxu3 }
  0x9e   :  { %v105_v50 = vpop.f32.mrf.mxu0  ;;  %v202_v53 = vadd.f32 %v201_v48, %v102_v45  ;;  %v320_v45 = vpop.permute.xlu2 %319 }
  0x9f   :  { %v134_v51 = vpop.f32.mrf.mxu1 }
  0xa0   :  { %v295_v62 = vadd.f32 %v282_v54, %v202_v53  ;;  %v418_v53 = vpop.permute.xlu1 %417 }
  0xa2   :  { %v307_v3 = vmax.f32 %v295_v62, 0.0 }
  0xa4   :  { %v160_v10 = vpop.f32.mrf.mxu2 }
  0xa5   :  { %v204_v55 = vpop.f32.mrf.mxu3 }
  0xa6   :  { %v205_v57 = vadd.f32 %v204_v55, %v105_v50  ;;  %v224_v58 = vpop.f32.mrf.mxu0  ;;  %v413_v55 = vpop.permute.xlu0 %412 }
  0xa7   :  { %v253_v59 = vpop.f32.mrf.mxu1  ;;  %v225_v26 = vadd.f32 %v224_v58, %v125_v40 }
  0xa8   :  { %v298_v61 = vadd.f32 %v287_v47, %v205_v57  ;;  %v254_v29 = vadd.f32 %v253_v59, %v154_v52 }
  0xa9   :  { %v290_v38 = vadd.f32 %v272_v63, %v225_v26 }
  0xaa   :  { %v310_v1 = vmax.f32 %v298_v61, 0.0  ;;  %v291_v39 = vadd.f32 %v272_v63, %v254_v29 }
  0xac   :  { %345 = vmatpush.msrb.mxu2 %v310_v1  ;;  %v163_v18 = vpop.f32.mrf.mxu2  ;;  %v303_v44 = vmax.f32 %v291_v39, 0.0 }
  0xae   :  { %346 = vmatpush.msrb.mxu2 %v307_v3  ;;  %v227_v5 = vpop.f32.mrf.mxu0 }
  0xaf   :  { %v256_v7 = vpop.f32.mrf.mxu1  ;;  %v228_v21 = vadd.f32 %v227_v5, %v128_v43  ;;  %v302_v43 = vmax.f32 %v290_v38, 0.0 }
  0xb0   :  { %347 = vmatpush.msrb.mxu2 %v304_v6  ;;  %v257_v24 = vadd.f32 %v256_v7, %v157_v0 }
  0xb1   :  { %v293_v33 = vadd.f32 %v277_v49, %v228_v21 }
  0xb2   :  { %348 = vmatpush.msrb.mxu2 %v301_v8  ;;  %v294_v35 = vadd.f32 %v277_v49, %v257_v24 }
  0xb3   :  { %500 = vmatmul.msk.f32.vlgmr.msrb.gmra.mxu2 %vm66_vm0, %v313_v9  ;;  %v305_v42 = vmax.f32 %v293_v33, 0.0 }
  0xb4   :  { %v306_v40 = vmax.f32 %v294_v35, 0.0 }
  0xb6   :  { %v230_v13 = vpop.f32.mrf.mxu0 }
  0xb7   :  { %v259_v14 = vpop.f32.mrf.mxu1  ;;  %v231_v17 = vadd.f32 %v230_v13, %v131_v46 }
  0xb8   :  { %v260_v19 = vadd.f32 %v259_v14, %v160_v10 }
  0xb9   :  { %v296_v28 = vadd.f32 %v282_v54, %v231_v17 }
  0xba   :  { %v297_v30 = vadd.f32 %v282_v54, %v260_v19 }
  0xbb   :  { %501 = vmatmul.msk.f32.gmra.mxu2 %vm66_vm0, %v314_v15  ;;  %v308_v37 = vmax.f32 %v296_v28, 0.0 }
  0xbc   :  { %v309_v41 = vmax.f32 %v297_v30, 0.0 }
  0xbe   :  { %v233_v20 = vpop.f32.mrf.mxu0 }
  0xbf   :  { %v234_v22 = vadd.f32 %v233_v20, %v134_v51  ;;  %v262_v23 = vpop.f32.mrf.mxu1 }
  0xc0   :  { %v263_v25 = vadd.f32 %v262_v23, %v163_v18 }
  0xc1   :  { %v299_v27 = vadd.f32 %v287_v47, %v234_v22 }
  0xc2   :  { %v300_v31 = vadd.f32 %v287_v47, %v263_v25  ;;  %v325_v47 = vpop.permute.xlu2 %324 }
  0xc3   :  { %v311_v32 = vmax.f32 %v299_v27, 0.0 }
  0xc4   :  { %v312_v36 = vmax.f32 %v300_v31, 0.0 }
  0xc5   :  { %368 = vmatpush.msrb.mxu3 %v311_v32  ;;  %v467_v32 = vlaneseq }
  0xc6   :  { %391 = vmatpush.msra.mxu2 %v312_v36 }
  0xc7   :  { %369 = vmatpush.msrb.mxu3 %v308_v37  ;;  %vm469_vm3 = vcmp.lt.s32.totalorder %v467_v32, 384 }
  0xc8   :  { %392 = vmatpush.msra.mxu2 %v309_v41 }
  0xc9   :  { %370 = vmatpush.msrb.mxu3 %v305_v42 }
  0xca   :  { %393 = vmatpush.msra.mxu2 %v306_v40  ;;  %v451_v24 = vpop.permute.xlu2 %450 }
  0xcb   :  { %371 = vmatpush.msrb.mxu3 %v302_v43  ;;  %v453_v29 = vperm.slane %v451_v24, 0 }
  0xcc   :  { %394 = vmatpush.msra.mxu2 %v303_v44  ;;  %502 = vmatmul.msk.f32.vlgmr.msrb.gmra.mxu3 %vm66_vm0, %v313_v9 }
  0xcd   :  { %504 = vmatmul.msk.f32.vlgmr.msra.gmra.mxu2 %vm66_vm0, %v313_v9 }
  0xd4   :  { %503 = vmatmul.msk.f32.gmra.mxu3 %vm66_vm0, %v314_v15 }
  0xd5   :  { %505 = vmatmul.msk.f32.gmra.mxu2 %vm66_vm0, %v314_v15 }
 0x136   :  { %v350_v46 = vpop.f32.mrf.mxu2 }
 0x137   :  { %v351_v50 = vadd.f32 %v350_v46, %v320_v45 }
 0x139   :  { %v402_v52 = vmax.f32 %v351_v50, 0.0 }
 0x13b   :  { %v420_v57 = vmul.f32 %v413_v55, %v402_v52 }
 0x13e   :  { %v353_v48 = vpop.f32.mrf.mxu2 }
 0x13f   :  { %v354_v49 = vadd.f32 %v353_v48, %v325_v47 }
 0x141   :  { %v405_v51 = vmax.f32 %v354_v49, 0.0 }
 0x143   :  { %v423_v54 = vmul.f32 %v418_v53, %v405_v51 }
 0x145   :  { %v426_v59 = vadd.f32 %v423_v54, %v420_v57 }
 0x147   :  { %v427_v62 = vrot.slane %v426_v59, 4 }
 0x149   :  { %v428_v5 = vadd.f32 %v427_v62, %v426_v59 }
 0x14b   :  { %v429_v12 = vrot.slane %v428_v5, 2 }
 0x14d   :  { %v430_v17 = vadd.f32 %v429_v12, %v428_v5 }
 0x14f   :  { %v373_v56 = vpop.f32.mrf.mxu3  ;;  %v431_v22 = vrot.slane %v430_v17, 1 }
 0x150   :  { %v396_v58 = vpop.f32.mrf.mxu2  ;;  %v374_v60 = vadd.f32 %v373_v56, %v320_v45 }
 0x151   :  { %v397_v61 = vadd.f32 %v396_v58, %v320_v45  ;;  %v432_v28 = vadd.f32 %v431_v22, %v430_v17 }
 0x152   :  { %v403_v0 = vmax.f32 %v374_v60, 0.0 }
 0x153   :  { %v404_v3 = vmax.f32 %v397_v61, 0.0  ;;  %v454_v35 = vadd.f32 %v453_v29, %v432_v28 }
 0x154   :  { %v421_v8 = vmul.f32 %v413_v55, %v403_v0 }
 0x155   :  { %v422_v10 = vmul.f32 %v413_v55, %v404_v3 }
 0x157   :  { %v376_v63 = vpop.f32.mrf.mxu3 }
 0x158   :  { %v377_v1 = vadd.f32 %v376_v63, %v325_v47  ;;  %v399_v2 = vpop.f32.mrf.mxu2 }
 0x159   :  { %v400_v4 = vadd.f32 %v399_v2, %v325_v47 }
 0x15a   :  { %v406_v6 = vmax.f32 %v377_v1, 0.0 }
 0x15b   :  { %v407_v7 = vmax.f32 %v400_v4, 0.0 }
 0x15c   :  { %v424_v9 = vmul.f32 %v418_v53, %v406_v6 }
 0x15d   :  { %v425_v11 = vmul.f32 %v418_v53, %v407_v7 }
 0x15e   :  { %v433_v13 = vadd.f32 %v424_v9, %v421_v8 }
 0x15f   :  { %v440_v14 = vadd.f32 %v425_v11, %v422_v10 }
 0x160   :  { %v434_v15 = vrot.slane %v433_v13, 4 }
 0x161   :  { %v441_v16 = vrot.slane %v440_v14, 4 }
 0x162   :  { %v435_v18 = vadd.f32 %v434_v15, %v433_v13 }
 0x163   :  { %v442_v19 = vadd.f32 %v441_v16, %v440_v14 }
 0x164   :  { %v436_v20 = vrot.slane %v435_v18, 2 }
 0x165   :  { %v443_v21 = vrot.slane %v442_v19, 2 }
 0x166   :  { %v437_v23 = vadd.f32 %v436_v20, %v435_v18 }
 0x167   :  { %v444_v25 = vadd.f32 %v443_v21, %v442_v19 }
 0x168   :  { %v438_v26 = vrot.slane %v437_v23, 1 }
 0x169   :  { %v445_v27 = vrot.slane %v444_v25, 1 }
 0x16a   :  { %v439_v30 = vadd.f32 %v438_v26, %v437_v23 }
 0x16b   :  { %v446_v31 = vadd.f32 %v445_v27, %v444_v25 }
 0x16c   :  { %v455_v33 = vadd.f32 %v453_v29, %v439_v30 }
 0x16d   :  { %v456_v34 = vadd.f32 %v453_v29, %v446_v31 }
 0x16e   :  { %v460_v36 = vrot.slane %v455_v33, 7 }
 0x16f   :  { %v461_v37 = vrot.slane %v456_v34, 6 }
 0x170   :  { %v463_v38 = vsel %vm462_vm1, %v454_v35, %v460_v36 }
 0x171   :  { %v465_v39 = vsel %vm464_vm2, %v463_v38, %v461_v37 }
 0x172   :  { %471 = vst.msk [vmem:[%s732_s9] sm:$0x7] %vm469_vm3, %v465_v39 }

</bundles_post_ra>
